<compile_context>
chip_gen: v7x
topology: tpu7x:2x2x1
jax: 0.10.0
libtpu: 0.0.40
codegen_flags: <defaults>
</compile_context>

<pallas_src>
from math import log2
from types import SimpleNamespace

import numpy as np
import jax
import jax.numpy as jnp
from jax import lax
from jax.experimental import pallas as pl
from jax.experimental.pallas import tpu as pltpu

_BN_EPS = 1e-5
NODE_GB = 8     # frontier nodes per grid step (node decoder)
LEAF_GB = 4     # leaves per grid step (leaf decoder) -- v7x VMEM safe


# ----------------------------------------------------------------------------
# In-kernel helpers (traced inside Pallas bodies)
# ----------------------------------------------------------------------------
def _elu(x):
    return jnp.where(x > 0.0, x, jnp.exp(jnp.minimum(x, 0.0)) - 1.0)


def _bn_elu(y, gamma, beta, parities=1):
    """BatchNorm(track_running_stats=False, batch-of-1) + ELU.

    y: (G, S, P*C) -- per group G, per channel c stats over the S rows and the
    P parity column blocks (P=1 -> plain per-column stats).  gamma/beta: (1,C).
    """
    G, S, N = y.shape
    P = parities
    C = N // P
    g = gamma.reshape(1, 1, C)
    b = beta.reshape(1, 1, C)
    inv = 1.0 / (S * P)
    parts = [y[:, :, p * C:(p + 1) * C] for p in range(P)]
    total = parts[0]
    for p in range(1, P):
        total = total + parts[p]
    mean = jnp.sum(total, axis=1, keepdims=True) * inv            # (G,1,C)
    cens = [pp - mean for pp in parts]
    sq = cens[0] * cens[0]
    for cc in cens[1:]:
        sq = sq + cc * cc
    var = jnp.sum(sq, axis=1, keepdims=True) * inv                 # (G,1,C)
    scale = lax.rsqrt(var + _BN_EPS) * g
    outs = [_elu(cc * scale + b) for cc in cens]
    return outs[0] if P == 1 else jnp.concatenate(outs, axis=-1)


# ----------------------------------------------------------------------------
# Kernel 1: root decoder = 1x1x1 ConvTranspose as matmul + bias + ELU
# ----------------------------------------------------------------------------
def _root_kernel(x_ref, w_ref, b_ref, o_ref):
    y = jnp.dot(x_ref[...], w_ref[...],
                preferred_element_type=jnp.float32) + b_ref[...]
    o_ref[...] = _elu(y)


def root_forward(latent, root):
    F = latent.shape[1]
    N = root["w"].shape[1]
    return pl.pallas_call(
        _root_kernel,
        out_shape=jax.ShapeDtypeStruct((1, N), jnp.float32),
        grid_spec=pltpu.PrefetchScalarGridSpec(
            num_scalar_prefetch=0,
            grid=(1,),
            in_specs=[pl.BlockSpec((1, F), lambda i: (0, 0)),
                      pl.BlockSpec((F, N), lambda i: (0, 0)),
                      pl.BlockSpec((1, N), lambda i: (0, 0))],
            out_specs=pl.BlockSpec((1, N), lambda i: (0, 0)),
        ),
        compiler_params=pltpu.CompilerParams(
            dimension_semantics=("arbitrary",)),
    )(latent.astype(jnp.float32), root["w"], root["b"])


# ----------------------------------------------------------------------------
# Kernel 2: fused node classifier (conv-as-matmul + mlp1 + ELU + mlp2),
# M-tiled over the frontier, bf16 MXU operands.
# ----------------------------------------------------------------------------
def _classifier_kernel(x_ref, wc_ref, bc_ref, w1_ref, b1_ref, w2_ref, b2_ref,
                       o_ref):
    h = jnp.dot(x_ref[...], wc_ref[...],
                preferred_element_type=jnp.float32) + bc_ref[...]
    h = _elu(jnp.dot(h, w1_ref[...],
                     preferred_element_type=jnp.float32) + b1_ref[...])
    o_ref[...] = jnp.dot(h, w2_ref[...],
                         preferred_element_type=jnp.float32) + b2_ref[...]


def classifier_logits(x, cls):
    M, K = x.shape
    F = cls["wc"].shape[1]
    H = cls["w1"].shape[1]
    tm = M if M <= 512 else 512
    assert M % tm == 0
    return pl.pallas_call(
        _classifier_kernel,
        out_shape=jax.ShapeDtypeStruct((M, 4), jnp.float32),
        grid_spec=pltpu.PrefetchScalarGridSpec(
            num_scalar_prefetch=0,
            grid=(M // tm,),
            in_specs=[
                pl.BlockSpec((tm, K), lambda i: (i, 0)),
                pl.BlockSpec((K, F), lambda i: (0, 0)),
                pl.BlockSpec((1, F), lambda i: (0, 0)),
                pl.BlockSpec((F, H), lambda i: (0, 0)),
                pl.BlockSpec((1, H), lambda i: (0, 0)),
                pl.BlockSpec((H, 4), lambda i: (0, 0)),
                pl.BlockSpec((1, 4), lambda i: (0, 0)),
            ],
            out_specs=pl.BlockSpec((tm, 4), lambda i: (i, 0)),
        ),
        compiler_params=pltpu.CompilerParams(
            dimension_semantics=("parallel",)),
    )(x, cls["wc"], cls["bc"], cls["w1"], cls["b1"], cls["w2"], cls["b2"])


# ----------------------------------------------------------------------------
# Kernel 3: fused node decoder.  Per grid step: Gb nodes; 3x3x3 mlp + BN + ELU
# + 8 fused child 1x1x1 deconvs + per-child BN + ELU, children written
# directly in (node, child, 64, NC) order (no XLA transpose afterwards).
# ----------------------------------------------------------------------------
def _node_kernel(cols_ref, w1_ref, g1_ref, b1_ref, w2_ref, g2_ref, b2_ref,
                 o_ref):
    Gb, S, K = cols_ref.shape
    NCI = w1_ref.shape[1]
    NC8 = w2_ref.shape[1]
    NC = NC8 // 8
    v = jnp.dot(cols_ref[...].reshape(Gb * S, K), w1_ref[...],
                preferred_element_type=jnp.float32).reshape(Gb, S, NCI)
    v = _bn_elu(v, g1_ref[...], b1_ref[...], parities=1)
    y = jnp.dot(v.reshape(Gb * S, NCI).astype(jnp.bfloat16), w2_ref[...],
                preferred_element_type=jnp.float32).reshape(Gb, S, NC8)
    y = _bn_elu(y, g2_ref[...], b2_ref[...], parities=1)
    for c in range(8):
        o_ref[:, c:c + 1, :, :] = (
            y[:, :, c * NC:(c + 1) * NC].reshape(Gb, 1, S, NC))


def node_children(cols, lvl):
    M, S, K = cols.shape
    NCI = lvl["w_mlp"].shape[1]
    NC8 = lvl["child_w"].shape[1]
    NC = NC8 // 8
    gb = NODE_GB
    assert M % gb == 0
    return pl.pallas_call(
        _node_kernel,
        out_shape=jax.ShapeDtypeStruct((M, 8, S, NC), jnp.float32),
        grid_spec=pltpu.PrefetchScalarGridSpec(
            num_scalar_prefetch=0,
            grid=(M // gb,),
            in_specs=[
                pl.BlockSpec((gb, S, K), lambda g: (g, 0, 0)),
                pl.BlockSpec((K, NCI), lambda g: (0, 0)),
                pl.BlockSpec((1, NCI), lambda g: (0, 0)),
                pl.BlockSpec((1, NCI), lambda g: (0, 0)),
                pl.BlockSpec((NCI, NC8), lambda g: (0, 0)),
                pl.BlockSpec((1, NC8), lambda g: (0, 0)),
                pl.BlockSpec((1, NC8), lambda g: (0, 0)),
            ],
            out_specs=pl.BlockSpec((gb, 8, S, NC), lambda g: (g, 0, 0, 0)),
        ),
        compiler_params=pltpu.CompilerParams(
            dimension_semantics=("parallel",)),
    )(cols, lvl["w_mlp"], lvl["bn_g"].reshape(1, NCI),
      lvl["bn_b"].reshape(1, NCI), lvl["child_w"],
      lvl["child_bn_g"].reshape(1, NC8), lvl["child_bn_b"].reshape(1, NC8))


# ----------------------------------------------------------------------------
# Kernel 4: leaf deconv2 (polyphase, all 8 parities in N) + BN2 (parity-folded
# stats) + ELU, Gb leaves per grid step.
# ----------------------------------------------------------------------------
def _leaf2_kernel(cols_ref, w_ref, g_ref, b_ref, o_ref):
    Gb, S, K = cols_ref.shape
    N = w_ref.shape[1]
    y = jnp.dot(cols_ref[...].reshape(Gb * S, K), w_ref[...],
                preferred_element_type=jnp.float32).reshape(Gb, S, N)
    o_ref[...] = _bn_elu(y, g_ref[...], b_ref[...], parities=8)


def leaf_deconv2(cols, leaf):
    L, S, K = cols.shape
    N = leaf["w2"].shape[1]
    C = N // 8
    gb = LEAF_GB
    assert L % gb == 0
    return pl.pallas_call(
        _leaf2_kernel,
        out_shape=jax.ShapeDtypeStruct((L, S, N), jnp.float32),
        grid_spec=pltpu.PrefetchScalarGridSpec(
            num_scalar_prefetch=0,
            grid=(L // gb,),
            in_specs=[
                pl.BlockSpec((gb, S, K), lambda g: (g, 0, 0)),
                pl.BlockSpec((K, N), lambda g: (0, 0)),
                pl.BlockSpec((1, C), lambda g: (0, 0)),
                pl.BlockSpec((1, C), lambda g: (0, 0)),
            ],
            out_specs=pl.BlockSpec((gb, S, N), lambda g: (g, 0, 0)),
        ),
        compiler_params=pltpu.CompilerParams(
            dimension_semantics=("parallel",)),
    )(cols, leaf["w2"], leaf["bn2_g"].reshape(1, C),
      leaf["bn2_b"].reshape(1, C))


# ----------------------------------------------------------------------------
# Kernel 5: leaf deconv3 (polyphase) + BN3 + ELU + 1x1x1 deconv4 (block-diag
# weight) + sigmoid + clamp -- fully fused, no HBM intermediate.
# ----------------------------------------------------------------------------
def _leaf3_kernel(cols_ref, w3_ref, g_ref, b_ref, w4_ref, o_ref):
    Gb, S, K = cols_ref.shape
    N = w3_ref.shape[1]
    V8 = w4_ref.shape[1]
    y = jnp.dot(cols_ref[...].reshape(Gb * S, K), w3_ref[...],
                preferred_element_type=jnp.float32).reshape(Gb, S, N)
    z = _bn_elu(y, g_ref[...], b_ref[...], parities=8)
    t = jnp.dot(z.reshape(Gb * S, N), w4_ref[...],
                preferred_element_type=jnp.float32).reshape(Gb, S, V8)
    t = pl.reciprocal(1.0 + jnp.exp(-t), approx=True)
    o_ref[...] = jnp.clip(t, 1e-7, 1.0 - 1e-7)


def leaf_deconv3_final(cols, leaf):
    L, S, K = cols.shape
    N = leaf["w3"].shape[1]
    C = N // 8
    V8 = leaf["w4"].shape[1]
    gb = LEAF_GB
    assert L % gb == 0
    return pl.pallas_call(
        _leaf3_kernel,
        out_shape=jax.ShapeDtypeStruct((L, S, V8), jnp.float32),
        grid_spec=pltpu.PrefetchScalarGridSpec(
            num_scalar_prefetch=0,
            grid=(L // gb,),
            in_specs=[
                pl.BlockSpec((gb, S, K), lambda g: (g, 0, 0)),
                pl.BlockSpec((K, N), lambda g: (0, 0)),
                pl.BlockSpec((1, C), lambda g: (0, 0)),
                pl.BlockSpec((1, C), lambda g: (0, 0)),
                pl.BlockSpec((N, V8), lambda g: (0, 0)),
            ],
            out_specs=pl.BlockSpec((gb, S, V8), lambda g: (g, 0, 0)),
        ),
        compiler_params=pltpu.CompilerParams(
            dimension_semantics=("parallel",)),
    )(cols, leaf["w3"], leaf["bn3_g"].reshape(1, C),
      leaf["bn3_b"].reshape(1, C), leaf["w4"])


# ----------------------------------------------------------------------------
# Channels-last im2col glue (only k=3 / pad=1 windows are ever needed now)
# ----------------------------------------------------------------------------
def _pad1_cl(x):
    return jnp.pad(x, ((0, 0), (1, 1), (1, 1), (1, 1), (0, 0)))


def _im2col_cl(xp, k):
    # xp: (B, Dp, Hp, Wp, C) -> (B, P, k^3*C), offset-major / channel-minor.
    B, Dp, Hp, Wp, C = xp.shape
    Do, Ho, Wo = Dp - k + 1, Hp - k + 1, Wp - k + 1
    cols = [xp[:, a:a + Do, b:b + Ho, c:c + Wo, :]
            for a in range(k) for b in range(k) for c in range(k)]
    p = jnp.stack(cols, axis=4)
    return p.reshape(B, Do * Ho * Wo, k ** 3 * C)


# ----------------------------------------------------------------------------
# Weight pre-flattening
# ----------------------------------------------------------------------------
def _deconv_weight_mat(w):
    # Stride-1, pad-1 ConvTranspose3d weight (Cin,Cout,3,3,3) -> (27*Cin,Cout)
    # matching the offset-major / channel-minor k=3 im2col of the pad-1 input.
    cin, cout, k = w.shape[0], w.shape[1], w.shape[2]
    wf = jnp.flip(w, axis=(2, 3, 4))
    return wf.transpose(2, 3, 4, 0, 1).reshape(k ** 3 * cin, cout)


# parity -> ((window offset u, kernel tap kk), ...)  for stride=2, k=4, p=1
_S2_TAPS = {0: ((0, 3), (1, 1)), 1: ((1, 2), (2, 0))}


def _deconv_s2_poly_mat(w):
    """Polyphase matrix for ConvTranspose3d(k=4, s=2, p=1).

    w: (Cin, Cout, 4, 4, 4) -> (27*Cin, 8*Cout).  Rows: k=3 window offsets of
    the pad-1 *undilated* input (offset-major, in-channel-minor).  Columns:
    the 8 output parities (parity-major, out-channel-minor).
    """
    w_np = np.asarray(w, np.float32)
    cin, cout = w_np.shape[0], w_np.shape[1]
    mat = np.zeros((3, 3, 3, cin, 2, 2, 2, cout), np.float32)
    for rd in (0, 1):
        for rh in (0, 1):
            for rw in (0, 1):
                for ud, kd in _S2_TAPS[rd]:
                    for uh, kh in _S2_TAPS[rh]:
                        for uw, kw in _S2_TAPS[rw]:
                            mat[ud, uh, uw, :, rd, rh, rw, :] = (
                                w_np[:, :, kd, kh, kw])
    return jnp.asarray(mat.reshape(27 * cin, 8 * cout))


# ----------------------------------------------------------------------------
# Batched sub-module forwards (features are (M, 64, NC) channels-last slabs)
# ----------------------------------------------------------------------------
@jax.jit
def root_decoder_fwd(root, latent):
    out = root_forward(latent, root)                    # (1, 64*NC)
    nc = out.shape[1] // 64
    return out.reshape(1, 64, nc)


@jax.jit
def classify_fwd(cls, feats):
    x = feats.reshape(feats.shape[0], -1).astype(jnp.bfloat16)
    return jnp.argmax(classifier_logits(x, cls), axis=1)


@jax.jit
def node_decoder_fwd(lvl, feats):
    # feats: (M, 64, NC) -> children (M*8, 64, NC); child c of node i at row
    # i*8 + c.  Emitted by the kernel already in (node, child) order.
    M, _, NC = feats.shape
    x = feats.reshape(M, 4, 4, 4, NC)
    cols = _im2col_cl(_pad1_cl(x), 3).astype(jnp.bfloat16)     # (M, 64, 27*NC)
    ch = node_children(cols, lvl)                              # (M, 8, 64, NC)
    return ch.reshape(M * 8, 64, NC)


@jax.jit
def leaf_decoder_fwd(leaf, feats):
    # feats: (L, 64, NC) -> (L, V, 16, 16, 16)   (leaf_dim=16 geometry)
    L, _, NC = feats.shape
    x = feats.reshape(L, 4, 4, 4, NC)
    # deconv2 (k=4,s=2,p=1  4->8) polyphase + BN2 + ELU, fused.
    cols2 = _im2col_cl(_pad1_cl(x), 3).astype(jnp.bfloat16)    # (L, 64, 27*NC)
    v = leaf_deconv2(cols2, leaf)                              # (L, 64, 8*32)
    v = v.reshape(L, 4, 4, 4, 2, 2, 2, 32).transpose(0, 1, 4, 2, 5, 3, 6, 7)
    v = v.reshape(L, 8, 8, 8, 32)
    # deconv3 (8->16) polyphase + BN3 + ELU + deconv4 + sigmoid + clamp, fused.
    cols3 = _im2col_cl(_pad1_cl(v), 3).astype(jnp.bfloat16)    # (L, 512, 864)
    out = leaf_deconv3_final(cols3, leaf)                      # (L, 512, 8*V)
    V = out.shape[2] // 8
    out = out.reshape(L, 8, 8, 8, 2, 2, 2, V).transpose(0, 7, 1, 4, 2, 5, 3, 6)
    return out.reshape(L, V, 16, 16, 16)


# ----------------------------------------------------------------------------
# Decoder.decode_tree: BFS over tree levels with batched device work (one host
# sync per level), then exact DFS-order reconstruction of the reference output.
# ----------------------------------------------------------------------------
def _pad_rows(x, mult):
    m = x.shape[0]
    mp = -(-m // mult) * mult
    if mp == m:
        return x
    pad = jnp.zeros((mp - m,) + x.shape[1:], x.dtype)
    return jnp.concatenate([x, pad], axis=0)


def decode_tree(params, cfg, latent_vector):
    n_levels = int(log2(cfg.grid_dim / cfg.leaf_dim))
    V = cfg.voxel_channels + 1
    ld = cfg.leaf_dim
    NC = cfg.node_channels

    if cfg.has_root_encoder:
        feats = root_decoder_fwd(params["root"], latent_vector)
    else:
        f = latent_vector.reshape(NC, 4, 4, 4)
        feats = jnp.transpose(f, (1, 2, 3, 0)).reshape(1, 64, NC)

    levels = []      # per level: list of (kind, label, aux) in BFS order
    leaf_bufs = []   # per level: decoded leaf batch (or None)
    depth = 1
    while feats is not None:
        M = feats.shape[0]
        cls_mult = 8 if M <= 512 else 512
        labels = np.asarray(jax.device_get(
            classify_fwd(params["cls"], _pad_rows(feats, cls_mult))))[:M]

        recs, internal_idx, leaf_idx = [], [], []
        for i in range(M):
            lab = int(labels[i])
            if lab == 3 and depth > n_levels:
                # max depth reached: decode a full leaf of ones instead
                recs.append(("ones", 0, None))
            elif lab == 3:
                recs.append(("internal", 3, len(internal_idx) * 8))
                internal_idx.append(i)
            else:
                recs.append(("leaf", lab, len(leaf_idx)))
                leaf_idx.append(i)
        levels.append(recs)

        if leaf_idx:
            lf = feats[jnp.asarray(np.array(leaf_idx, np.int32))]
            leaf_bufs.append(leaf_decoder_fwd(
                params["leaf"], _pad_rows(lf, LEAF_GB))[:len(leaf_idx)])
        else:
            leaf_bufs.append(None)

        if internal_idx:
            pf = feats[jnp.asarray(np.array(internal_idx, np.int32))]
            feats = node_decoder_fwd(
                params["node_decoders"][depth - 1],
                _pad_rows(pf, NODE_GB))[:len(internal_idx) * 8]
            depth += 1
        else:
            feats = None

    # Re-emit node types / leaf features in the exact stack (pre-order DFS,
    # children 0..7) order of the reference implementation.
    node_types, leaf_refs = [], []

    def dfs(level, pos):
        kind, lab, aux = levels[level][pos]
        node_types.append(np.array([lab]))
        if kind == "internal":
            for c in range(8):
                dfs(level + 1, aux + c)
        elif kind == "leaf":
            leaf_refs.append((level, aux))
        else:
            leaf_refs.append(None)

    dfs(0, 0)

    offsets, bufs, off = {}, [], 0
    for lvl, buf in enumerate(leaf_bufs):
        if buf is not None:
            offsets[lvl] = off
            off += buf.shape[0]
            bufs.append(buf)
    ones_off = off
    if any(r is None for r in leaf_refs):
        bufs.append(jnp.ones((1, V, ld, ld, ld), jnp.float32))
    all_leaves = bufs[0] if len(bufs) == 1 else jnp.concatenate(bufs, axis=0)
    order = [ones_off if r is None else offsets[r[0]] + r[1] for r in leaf_refs]
    features = jnp.flip(all_leaves[jnp.asarray(np.array(order, np.int32))],
                        axis=0)
    node_types_sorted = np.squeeze(np.flip(np.array(node_types)))
    return features, node_types_sorted


# ----------------------------------------------------------------------------
# Deterministic parameter init (shapes from the module __init__); all weights
# are pre-flattened / polyphase-decomposed once here.
# ----------------------------------------------------------------------------
def _xavier(key, shape, gain=float(np.sqrt(2.0))):
    recf = int(np.prod(shape[2:])) if len(shape) > 2 else 1
    fan_in = shape[1] * recf
    fan_out = shape[0] * recf
    bound = gain * float(np.sqrt(6.0 / (fan_in + fan_out)))
    return jax.random.uniform(key, shape, jnp.float32, -bound, bound)


def init_params(key, cfg):
    assert cfg.leaf_dim == 16, "only leaf_dim=16 decoder geometry implemented"
    # TODO(synk): leaf_dim=32 (three stride-2 deconvs) needs an extra stage.
    NC, NCI = cfg.node_channels, cfg.node_channels_internal
    F, Hd = cfg.feature_code_size, cfg.classifier_hidden_size
    V = cfg.voxel_channels + 1
    n_levels = int(log2(cfg.grid_dim / cfg.leaf_dim))
    keys = iter(jax.random.split(key, 128))
    nk = lambda: next(keys)
    unif = lambda shape, a=0.05: jax.random.uniform(nk(), shape, jnp.float32, -a, a)

    # Root: ConvTranspose3d(F, NC, 4, s=1) with bias, on a 1x1x1 input.
    root_w = _xavier(nk(), (F, NC, 4, 4, 4))
    root = {"w": root_w.transpose(0, 2, 3, 4, 1).reshape(F, 64 * NC),
            "b": jnp.tile(unif((NC,)), 64).reshape(1, 64 * NC)}

    # Classifier: Conv3d(NC, F, 4) + Linear(F, Hd) + ELU + Linear(Hd, 4).
    cls_w = _xavier(nk(), (F, NC, 4, 4, 4), gain=1.0)
    cls = {"wc": cls_w.transpose(2, 3, 4, 1, 0).reshape(64 * NC, F)
                      .astype(jnp.bfloat16),
           "bc": unif((1, F)),
           "w1": _xavier(nk(), (Hd, F), gain=1.0).T, "b1": unif((1, Hd)),
           "w2": _xavier(nk(), (4, Hd), gain=1.0).T, "b2": unif((1, 4))}

    # Leaf decoder (leaf_dim=16: ks=[4,4,1], ss=[2,2,1], ps=[1,1,0]).
    w2 = _xavier(nk(), (NC, 32, 4, 4, 4))
    w3 = _xavier(nk(), (32, 16, 4, 4, 4))
    w4 = _xavier(nk(), (16, V, 1, 1, 1))
    w4_mat = np.asarray(w4[:, :, 0, 0, 0])                      # (16, V)
    w4blk = np.zeros((8 * 16, 8 * V), np.float32)                # block-diag
    for p in range(8):
        w4blk[p * 16:(p + 1) * 16, p * V:(p + 1) * V] = w4_mat
    leaf = {"w2": _deconv_s2_poly_mat(w2).astype(jnp.bfloat16),  # (27*NC, 256)
            "bn2_g": jnp.ones((32,), jnp.float32),
            "bn2_b": jnp.zeros((32,), jnp.float32),
            "w3": _deconv_s2_poly_mat(w3).astype(jnp.bfloat16),  # (864, 128)
            "bn3_g": jnp.ones((16,), jnp.float32),
            "bn3_b": jnp.zeros((16,), jnp.float32),
            "w4": jnp.asarray(w4blk)}                            # (128, 8*V)

    node_decoders = []
    for _ in range(n_levels):
        w_mlp = _xavier(nk(), (NC, NCI, 3, 3, 3))
        child_ws = [_xavier(nk(), (NCI, NC, 1, 1, 1))[:, :, 0, 0, 0]
                    for _ in range(8)]
        node_decoders.append({
            "w_mlp": _deconv_weight_mat(w_mlp).astype(jnp.bfloat16),
            "bn_g": jnp.ones((NCI,), jnp.float32),
            "bn_b": jnp.zeros((NCI,), jnp.float32),
            "child_w": jnp.concatenate(child_ws, axis=1).astype(jnp.bfloat16),
            "child_bn_g": jnp.ones((8 * NC,), jnp.float32),
            "child_bn_b": jnp.zeros((8 * NC,), jnp.float32),
        })

    return {"root": root, "cls": cls, "leaf": leaf,
            "node_decoders": node_decoders}


# ----------------------------------------------------------------------------
if __name__ == "__main__":
    cfg = SimpleNamespace(
        grid_dim=64,                 # smallest legal grid
        leaf_dim=16,                 # leaf cubes of 16^3 voxels
        feature_code_size=64,
        classifier_hidden_size=32,
        node_channels=32,
        node_channels_internal=32,
        voxel_channels=0,            # occupancy only -> 1 output channel
        has_root_encoder=True,
    )
    key = jax.random.PRNGKey(0)
    pkey, xkey = jax.random.split(key)
    params = init_params(pkey, cfg)
    latent_vector = jax.random.normal(xkey, (1, cfg.feature_code_size),
                                      jnp.float32)

    features, node_types = decode_tree(params, cfg, latent_vector)
    features = jax.block_until_ready(features)
    assert features.shape[1:] == (cfg.voxel_channels + 1, cfg.leaf_dim,
                                  cfg.leaf_dim, cfg.leaf_dim)
    assert bool(jnp.all(jnp.isfinite(features)))
    # TODO(synk): loss helpers (_recon_loss_*, decode_loss) are training-only
    # and not part of forward(); they are not ported.
    print("KERNEL_OK")
</pallas_src>

<mosaic_0001>
module attributes {stable_mosaic.version = 11 : i64} {
  func.func @_root_kernel(%arg0: i32, %arg1: memref<1x64xf32, #tpu.memory_space<vmem>>, %arg2: memref<64x2048xf32, #tpu.memory_space<vmem>>, %arg3: memref<1x2048xf32, #tpu.memory_space<vmem>>, %arg4: memref<1x2048xf32, #tpu.memory_space<vmem>>) attributes {dimension_semantics = [#tpu.dimension_semantics<arbitrary>], iteration_bounds = array<i64: 1>, scalar_prefetch = 0 : i64, scratch_operands = 0 : i64, tpu.core_type = #tpu.core_type<tc>, window_params = [{pipeline_mode = #tpu.pipeline_mode<synchronous>, transform_indices = @transform_0, window_bounds = array<i64: 1, 64>}, {pipeline_mode = #tpu.pipeline_mode<synchronous>, transform_indices = @transform_1, window_bounds = array<i64: 64, 2048>}, {pipeline_mode = #tpu.pipeline_mode<synchronous>, transform_indices = @transform_2, window_bounds = array<i64: 1, 2048>}, {pipeline_mode = #tpu.pipeline_mode<synchronous>, transform_indices = @transform_3, window_bounds = array<i64: 1, 2048>}]} {
    %c0 = arith.constant 0 : index
    %c0_0 = arith.constant 0 : index
    %0 = vector.load %arg1[%c0, %c0_0] : memref<1x64xf32, #tpu.memory_space<vmem>>, vector<1x64xf32>
    %c0_1 = arith.constant 0 : index
    %c0_2 = arith.constant 0 : index
    %1 = vector.load %arg2[%c0_1, %c0_2] : memref<64x2048xf32, #tpu.memory_space<vmem>>, vector<64x2048xf32>
    %cst = arith.constant dense<0.000000e+00> : vector<1x2048xf32>
    %2 = tpu.matmul %0, %1, %cst {dimension_numbers = #tpu.dot_dimension_numbers<[1], [0], [0], [1], [0, 0, 1, 1], [], []>} : vector<1x64xf32>, vector<64x2048xf32>, vector<1x2048xf32> -> vector<1x2048xf32>
    %c0_3 = arith.constant 0 : index
    %c0_4 = arith.constant 0 : index
    %3 = vector.load %arg3[%c0_3, %c0_4] : memref<1x2048xf32, #tpu.memory_space<vmem>>, vector<1x2048xf32>
    %4 = arith.addf %2, %3 : vector<1x2048xf32>
    %cst_5 = arith.constant 0.000000e+00 : f32
    %5 = vector.broadcast %cst_5 : f32 to vector<1x2048xf32>
    %6 = arith.cmpf ogt, %4, %5 : vector<1x2048xf32>
    %cst_6 = arith.constant 0.000000e+00 : f32
    %7 = vector.broadcast %cst_6 : f32 to vector<1x2048xf32>
    %8 = arith.minimumf %4, %7 : vector<1x2048xf32>
    %9 = math.exp %8 : vector<1x2048xf32>
    %cst_7 = arith.constant 1.000000e+00 : f32
    %10 = vector.broadcast %cst_7 : f32 to vector<1x2048xf32>
    %11 = arith.subf %9, %10 : vector<1x2048xf32>
    %12 = arith.select %6, %4, %11 : vector<1x2048xi1>, vector<1x2048xf32>
    %c0_8 = arith.constant 0 : index
    %c0_9 = arith.constant 0 : index
    %13 = vector.load %arg4[%c0_8, %c0_9] : memref<1x2048xf32, #tpu.memory_space<vmem>>, vector<1x2048xf32>
    tpu.vector_store %arg4[%c0_8, %c0_9], %12 {strides = array<i32>} : memref<1x2048xf32, #tpu.memory_space<vmem>>, vector<1x2048xf32>,
    return
  }
  func.func @transform_0(%arg0: i32) -> (i32, i32) {
    %c0_i32 = arith.constant 0 : i32
    %c0_i32_0 = arith.constant 0 : i32
    %c0_i32_1 = arith.constant 0 : i32
    return %c0_i32, %c0_i32_0 : i32, i32
  }
  func.func @transform_1(%arg0: i32) -> (i32, i32) {
    %c0_i32 = arith.constant 0 : i32
    %c0_i32_0 = arith.constant 0 : i32
    %c0_i32_1 = arith.constant 0 : i32
    return %c0_i32, %c0_i32_0 : i32, i32
  }
  func.func @transform_2(%arg0: i32) -> (i32, i32) {
    %c0_i32 = arith.constant 0 : i32
    %c0_i32_0 = arith.constant 0 : i32
    %c0_i32_1 = arith.constant 0 : i32
    return %c0_i32, %c0_i32_0 : i32, i32
  }
  func.func @transform_3(%arg0: i32) -> (i32, i32) {
    %c0_i32 = arith.constant 0 : i32
    %c0_i32_0 = arith.constant 0 : i32
    %c0_i32_1 = arith.constant 0 : i32
    return %c0_i32, %c0_i32_0 : i32, i32
  }
}

</mosaic_0001>

<bundles_post_ra>
// kernel: root_decoder_fwd.1
= control target key start
LH: loop header
LB: loop body
LE: loop exit
PB: predicated region body
PF: predicated region fallthrough
CT: control target
= control target key end

     0   :  { %8 = vsyncpa [#allocation3], 0  ;;  %s1465_s0 = inlined_call_operand.vmem [shape: f32[1,64], index: 0, kind: input, shape index: {}]   ;;  %s1466_s1 = inlined_call_operand.hbm [shape: f32[64,2048], index: 1, kind: input, shape index: {}]   ;;  %s1467_s2 = inlined_call_operand.hbm [shape: f32[1,2048], index: 2, kind: input, shape index: {}]   ;;  %s1468_s3 = inlined_call_operand.vmem [shape: f32[1,2048], index: 3, kind: output, shape index: {}]  }
   0x1   :  { %9 = vsyncpa [#allocation5], 0  ;;  %s1283_s12 = smov [#allocation2]   ;;  %s1235_s16 = scalar_lea.hbm %s1466_s1, 16384 }
   0x2   :  { %s17_s13 = sshll.u32 %s1283_s12, 4  ;;  %p1236_p0 = scmp.ne.s32.totalorder %s1466_s1, %s1235_s16  ;;  %s18_s13 = int_to_ptr.vmem [resolvable:$true] %s17_s13 }
   0x3   :  { %p1239_p1 = scmp.lt.u32.totalorder %s1235_s16, %s1466_s1 }
   0x5   :  { %p1241_p2 = pnand %p1239_p1, %p1236_p0 }
   0x7   :  { %1244 = shalt.err (!%p1241_p2)
}
   0x8   :  { %s1245_s21 = scalar_lea.vmem %s18_s13, 16384  ;;  %p1250_p4 = scmp.lt.s32.totalorder %s18_s13, %s18_s13 }
   0x9   :  { %p1246_p3 = scmp.ne.s32.totalorder %s18_s13, %s1245_s21  ;;  %p1251_p5 = scmp.lt.s32.totalorder %s1245_s21, %s1245_s21 }
   0xb   :  { %p1252_p6 = por %p1251_p5, %p1250_p4 }
   0xd   :  { %p1253_p7 = pnand %p1252_p6, %p1246_p3 }
   0xf   :  { %1256 = shalt.err (!%p1253_p7)
}
  0x10   :  { %s1284_s22 = smov 2048   ;;  %s1285_s23 = smov 128  }
  0x11   :  { %23 = dma.hbm_to_vmem [thread:$0]  %s1466_s1, 16384, %s18_s13, [#allocation3], %s1284_s22, %s1284_s22, %s1285_s23  }
  0x12   :  { %s1286_s26 = smov [#allocation4]   ;;  %s1257_s30 = scalar_lea.hbm %s1467_s2, 256 }
  0x13   :  { %s30_s27 = sshll.u32 %s1286_s26, 4  ;;  %p1258_p8 = scmp.ne.s32.totalorder %s1467_s2, %s1257_s30  ;;  %s31_s27 = int_to_ptr.vmem [resolvable:$true] %s30_s27 }
  0x14   :  { %p1261_p9 = scmp.lt.u32.totalorder %s1257_s30, %s1467_s2 }
  0x16   :  { %p1263_p10 = pnand %p1261_p9, %p1258_p8 }
  0x18   :  { %1266 = shalt.err (!%p1263_p10)
}
  0x19   :  { %s1267_s8 = scalar_lea.vmem %s31_s27, 256  ;;  %p1272_p12 = scmp.lt.s32.totalorder %s31_s27, %s31_s27 }
  0x1a   :  { %p1268_p11 = scmp.ne.s32.totalorder %s31_s27, %s1267_s8  ;;  %p1273_p13 = scmp.lt.s32.totalorder %s1267_s8, %s1267_s8 }
  0x1c   :  { %p1274_p0 = por %p1273_p13, %p1272_p12 }
  0x1e   :  { %p1275_p1 = pnand %p1274_p0, %p1268_p11 }
  0x20   :  { %1278 = shalt.err (!%p1275_p1)
}
  0x21   :  { %33 = dma.hbm_to_vmem [thread:$0]  %s1467_s2, 256, %s31_s27, [#allocation5]  }
  0x22   :  { %1279 = dma.done.wait [#allocation3], 16384  }
  0x23   :  { %1280 = vsyncadd [#allocation3], 4294950912 }
  0x24   :  { %1281 = dma.done.wait [#allocation5], 256  }
  0x25   :  { %1282 = vsyncadd [#allocation5], 4294967040  ;;  %v1287_v0 = vmov 0.0   ;;  %v42_v1 = vld [vmem:[#allocation2 + $0x8] sm:$0xff]  ;;  %v44_v3 = vld [vmem:[#allocation2 + $0x18] sm:$0xff]  ;;  %vm253_vm0 = vcmask 523264  }
  0x26   :  { %321 = vmatprep.mubr.f32.mxu0 %v1287_v0  ;;  %392 = vmatprep.mubr.f32.mxu1 %v1287_v0  ;;  %v58_v2 = vld [vmem:[#allocation2 + $0x88] sm:$0xff]  ;;  %v60_v5 = vld [vmem:[#allocation2 + $0x98] sm:$0xff]  ;;  %v41_v6 = vld [vmem:[#allocation2] sm:$0xff] }
  0x27   :  { %v1069_v4 = vpack.c.bf16 %v58_v2, %v42_v1  ;;  %v57_v7 = vld [vmem:[#allocation2 + $0x80] sm:$0xff]  ;;  %v1085_v8 = vpack.c.bf16 %v60_v5, %v44_v3  ;;  %v43_v10 = vld [vmem:[#allocation2 + $0x10] sm:$0xff]  ;;  %v74_v12 = vld [vmem:[#allocation2 + $0x108] sm:$0xff] }
  0x28   :  { %v1071_v9 = vpack.c.bf16 %v57_v7, %v41_v6  ;;  %v59_v11 = vld [vmem:[#allocation2 + $0x90] sm:$0xff]  ;;  %v90_v14 = vld [vmem:[#allocation2 + $0x188] sm:$0xff]  ;;  %v76_v15 = vld [vmem:[#allocation2 + $0x118] sm:$0xff] }
  0x29   :  { %1070 = vmatprep.subr.bf16.mxu0 %v1069_v4  ;;  %v1087_v13 = vpack.c.bf16 %v59_v11, %v43_v10  ;;  %v92_v16 = vld [vmem:[#allocation2 + $0x198] sm:$0xff]  ;;  %1086 = vmatprep.subr.bf16.mxu1 %v1085_v8  ;;  %v1073_v17 = vpack.c.bf16 %v90_v14, %v74_v12  ;;  %v73_v19 = vld [vmem:[#allocation2 + $0x100] sm:$0xff]  ;;  %v75_v21 = vld [vmem:[#allocation2 + $0x110] sm:$0xff] }
  0x2a   :  { %1072 = vmatpush1.bf16.msra.mxu0 %v1071_v9  ;;  %v1089_v18 = vpack.c.bf16 %v92_v16, %v76_v15  ;;  %v89_v20 = vld [vmem:[#allocation2 + $0x180] sm:$0xff]  ;;  %v91_v23 = vld [vmem:[#allocation2 + $0x190] sm:$0xff]  ;;  %v106_v24 = vld [vmem:[#allocation2 + $0x208] sm:$0xff] }
  0x2b   :  { %1088 = vmatpush1.bf16.msra.mxu1 %v1087_v13  ;;  %v1075_v22 = vpack.c.bf16 %v89_v20, %v73_v19  ;;  %v122_v25 = vld [vmem:[#allocation2 + $0x288] sm:$0xff]  ;;  %1074 = vmatprep.subr.bf16.mxu0 %v1073_v17  ;;  %v1091_v26 = vpack.c.bf16 %v91_v23, %v75_v21  ;;  %v108_v28 = vld [vmem:[#allocation2 + $0x218] sm:$0xff]  ;;  %v105_v30 = vld [vmem:[#allocation2 + $0x200] sm:$0xff] }
  0x2c   :  { %1090 = vmatprep.subr.bf16.mxu1 %v1089_v18  ;;  %v1077_v27 = vpack.c.bf16 %v122_v25, %v106_v24  ;;  %v124_v29 = vld [vmem:[#allocation2 + $0x298] sm:$0xff]  ;;  %v121_v32 = vld [vmem:[#allocation2 + $0x280] sm:$0xff]  ;;  %v107_v33 = vld [vmem:[#allocation2 + $0x210] sm:$0xff] }
  0x2d   :  { %v1093_v31 = vpack.c.bf16 %v124_v29, %v108_v28  ;;  %v123_v34 = vld [vmem:[#allocation2 + $0x290] sm:$0xff]  ;;  %v1079_v35 = vpack.c.bf16 %v121_v32, %v105_v30  ;;  %v138_v36 = vld [vmem:[#allocation2 + $0x308] sm:$0xff]  ;;  %v140_v38 = vld [vmem:[#allocation2 + $0x318] sm:$0xff] }
  0x2e   :  { %1076 = vmatpush1.bf16.msra.mxu0 %v1075_v22  ;;  %v154_v37 = vld [vmem:[#allocation2 + $0x388] sm:$0xff]  ;;  %v1095_v39 = vpack.c.bf16 %v123_v34, %v107_v33  ;;  %v156_v41 = vld [vmem:[#allocation2 + $0x398] sm:$0xff]  ;;  %v137_v42 = vld [vmem:[#allocation2 + $0x300] sm:$0xff] }
  0x2f   :  { %1092 = vmatpush1.bf16.msra.mxu1 %v1091_v26  ;;  %1078 = vmatprep.subr.bf16.mxu0 %v1077_v27  ;;  %v1081_v40 = vpack.c.bf16 %v154_v37, %v138_v36  ;;  %v153_v43 = vld [vmem:[#allocation2 + $0x380] sm:$0xff]  ;;  %v1097_v44 = vpack.c.bf16 %v156_v41, %v140_v38  ;;  %v139_v45 = vld [vmem:[#allocation2 + $0x310] sm:$0xff]  ;;  %v46_v47 = vld [vmem:[#allocation2 + $0x28] sm:$0xff] }
  0x30   :  { %1094 = vmatprep.subr.bf16.mxu1 %v1093_v31  ;;  %v155_v46 = vld [vmem:[#allocation2 + $0x390] sm:$0xff]  ;;  %v62_v48 = vld [vmem:[#allocation2 + $0xa8] sm:$0xff]  ;;  %v48_v49 = vld [vmem:[#allocation2 + $0x38] sm:$0xff]  ;;  %v1083_v50 = vpack.c.bf16 %v153_v43, %v137_v42 }
  0x31   :  { %v64_v51 = vld [vmem:[#allocation2 + $0xb8] sm:$0xff]  ;;  %v1099_v52 = vpack.c.bf16 %v155_v46, %v139_v45  ;;  %v1101_v53 = vpack.c.bf16 %v62_v48, %v46_v47  ;;  %v45_v54 = vld [vmem:[#allocation2 + $0x20] sm:$0xff]  ;;  %v47_v56 = vld [vmem:[#allocation2 + $0x30] sm:$0xff] }
  0x32   :  { %1080 = vmatpush1.bf16.msra.mxu0 %v1079_v35  ;;  %v61_v55 = vld [vmem:[#allocation2 + $0xa0] sm:$0xff]  ;;  %v1117_v57 = vpack.c.bf16 %v64_v51, %v48_v49  ;;  %v63_v58 = vld [vmem:[#allocation2 + $0xb0] sm:$0xff]  ;;  %v78_v59 = vld [vmem:[#allocation2 + $0x128] sm:$0xff] }
  0x33   :  { %1096 = vmatpush1.bf16.msra.mxu1 %v1095_v39  ;;  %1082 = vmatprep.subr.bf16.mxu0 %v1081_v40  ;;  %v94_v60 = vld [vmem:[#allocation2 + $0x1a8] sm:$0xff]  ;;  %v80_v61 = vld [vmem:[#allocation2 + $0x138] sm:$0xff]  ;;  %v1338_v63 = vld [vmem:[%s1465_s0] sm:$0x1]  ;;  %v1103_v1 = vpack.c.bf16 %v61_v55, %v45_v54  ;;  %v1119_v2 = vpack.c.bf16 %v63_v58, %v47_v56 }
  0x34   :  { %1098 = vmatprep.subr.bf16.mxu1 %v1097_v44  ;;  %v96_v62 = vld [vmem:[#allocation2 + $0x1b8] sm:$0xff]  ;;  %v1105_v3 = vpack.c.bf16 %v94_v60, %v78_v59  ;;  %v77_v4 = vld [vmem:[#allocation2 + $0x120] sm:$0xff]  ;;  %v79_v6 = vld [vmem:[#allocation2 + $0x130] sm:$0xff] }
  0x35   :  { %v93_v5 = vld [vmem:[#allocation2 + $0x1a0] sm:$0xff]  ;;  %v1121_v7 = vpack.c.bf16 %v96_v62, %v80_v61  ;;  %v95_v8 = vld [vmem:[#allocation2 + $0x1b0] sm:$0xff]  ;;  %v110_v9 = vld [vmem:[#allocation2 + $0x228] sm:$0xff] }
  0x36   :  { %1084 = vmatpush1.bf16.msra.mxu0 %v1083_v50  ;;  %v126_v10 = vld [vmem:[#allocation2 + $0x2a8] sm:$0xff]  ;;  %v112_v11 = vld [vmem:[#allocation2 + $0x238] sm:$0xff]  ;;  %v1107_v13 = vpack.c.bf16 %v93_v5, %v77_v4  ;;  %v1123_v14 = vpack.c.bf16 %v95_v8, %v79_v6  ;;  %v109_v16 = vld [vmem:[#allocation2 + $0x220] sm:$0xff] }
  0x37   :  { %1100 = vmatpush1.bf16.msra.mxu1 %v1099_v52  ;;  %1102 = vmatprep.subr.bf16.mxu0 %v1101_v53  ;;  %v128_v12 = vld [vmem:[#allocation2 + $0x2b8] sm:$0xff]  ;;  %v1109_v15 = vpack.c.bf16 %v126_v10, %v110_v9  ;;  %v125_v17 = vld [vmem:[#allocation2 + $0x2a0] sm:$0xff]  ;;  %v111_v18 = vld [vmem:[#allocation2 + $0x230] sm:$0xff] }
  0x38   :  { %1118 = vmatprep.subr.bf16.mxu1 %v1117_v57  ;;  %v1125_v19 = vpack.c.bf16 %v128_v12, %v112_v11  ;;  %v127_v20 = vld [vmem:[#allocation2 + $0x2b0] sm:$0xff]  ;;  %v142_v21 = vld [vmem:[#allocation2 + $0x328] sm:$0xff]  ;;  %v144_v23 = vld [vmem:[#allocation2 + $0x338] sm:$0xff]  ;;  %v1111_v25 = vpack.c.bf16 %v125_v17, %v109_v16 }
  0x39   :  { %1045 = vmatmul.mubr.msk.f32.vlgmr.msra.gmra.mrb[0].mxu0 %vm253_vm0, %v1338_v63  ;;  %v158_v22 = vld [vmem:[#allocation2 + $0x3a8] sm:$0xff]  ;;  %v160_v24 = vld [vmem:[#allocation2 + $0x3b8] sm:$0xff]  ;;  %v1127_v26 = vpack.c.bf16 %v127_v20, %v111_v18  ;;  %v141_v28 = vld [vmem:[#allocation2 + $0x320] sm:$0xff] }
  0x3a   :  { %1046 = vmatmul.mubr.msk.f32.vlgmr.msra.gmra.mrb[0].mxu1 %vm253_vm0, %v1338_v63  ;;  %1104 = vmatpush1.bf16.msra.mxu0 %v1103_v1  ;;  %v1113_v27 = vpack.c.bf16 %v158_v22, %v142_v21  ;;  %v157_v29 = vld [vmem:[#allocation2 + $0x3a0] sm:$0xff]  ;;  %v143_v30 = vld [vmem:[#allocation2 + $0x330] sm:$0xff]  ;;  %v1129_v31 = vpack.c.bf16 %v160_v24, %v144_v23  ;;  %v50_v33 = vld [vmem:[#allocation2 + $0x48] sm:$0xff] }
  0x3b   :  { %1120 = vmatpush1.bf16.msra.mxu1 %v1119_v2  ;;  %1106 = vmatprep.subr.bf16.mxu0 %v1105_v3  ;;  %v159_v32 = vld [vmem:[#allocation2 + $0x3b0] sm:$0xff]  ;;  %v66_v34 = vld [vmem:[#allocation2 + $0xc8] sm:$0xff]  ;;  %v52_v35 = vld [vmem:[#allocation2 + $0x58] sm:$0xff]  ;;  %v1115_v37 = vpack.c.bf16 %v157_v29, %v141_v28 }
  0x3c   :  { %1122 = vmatprep.subr.bf16.mxu1 %v1121_v7  ;;  %463 = vmatprep.mubr.f32.mxu0 %v1287_v0  ;;  %v68_v36 = vld [vmem:[#allocation2 + $0xd8] sm:$0xff]  ;;  %v1131_v38 = vpack.c.bf16 %v159_v32, %v143_v30  ;;  %v1133_v39 = vpack.c.bf16 %v66_v34, %v50_v33  ;;  %v49_v40 = vld [vmem:[#allocation2 + $0x40] sm:$0xff]  ;;  %v51_v42 = vld [vmem:[#allocation2 + $0x50] sm:$0xff] }
  0x3d   :  { %534 = vmatprep.mubr.f32.mxu1 %v1287_v0  ;;  %v65_v41 = vld [vmem:[#allocation2 + $0xc0] sm:$0xff]  ;;  %v1149_v43 = vpack.c.bf16 %v68_v36, %v52_v35  ;;  %v67_v44 = vld [vmem:[#allocation2 + $0xd0] sm:$0xff]  ;;  %v82_v45 = vld [vmem:[#allocation2 + $0x148] sm:$0xff] }
  0x3e   :  { %1108 = vmatpush1.bf16.msra.mxu0 %v1107_v13  ;;  %v98_v46 = vld [vmem:[#allocation2 + $0x1c8] sm:$0xff]  ;;  %v84_v47 = vld [vmem:[#allocation2 + $0x158] sm:$0xff]  ;;  %v1135_v49 = vpack.c.bf16 %v65_v41, %v49_v40  ;;  %v1151_v50 = vpack.c.bf16 %v67_v44, %v51_v42  ;;  %v81_v52 = vld [vmem:[#allocation2 + $0x140] sm:$0xff] }
  0x3f   :  { %1124 = vmatpush1.bf16.msra.mxu1 %v1123_v14  ;;  %1110 = vmatprep.subr.bf16.mxu0 %v1109_v15  ;;  %v100_v48 = vld [vmem:[#allocation2 + $0x1d8] sm:$0xff]  ;;  %v1137_v51 = vpack.c.bf16 %v98_v46, %v82_v45  ;;  %v97_v53 = vld [vmem:[#allocation2 + $0x1c0] sm:$0xff]  ;;  %v83_v54 = vld [vmem:[#allocation2 + $0x150] sm:$0xff] }
  0x40   :  { %1126 = vmatprep.subr.bf16.mxu1 %v1125_v19  ;;  %v1153_v55 = vpack.c.bf16 %v100_v48, %v84_v47  ;;  %v99_v56 = vld [vmem:[#allocation2 + $0x1d0] sm:$0xff]  ;;  %v114_v57 = vld [vmem:[#allocation2 + $0x248] sm:$0xff]  ;;  %v116_v59 = vld [vmem:[#allocation2 + $0x258] sm:$0xff]  ;;  %v1139_v61 = vpack.c.bf16 %v97_v53, %v81_v52 }
  0x41   :  { %v130_v58 = vld [vmem:[#allocation2 + $0x2c8] sm:$0xff]  ;;  %v132_v60 = vld [vmem:[#allocation2 + $0x2d8] sm:$0xff]  ;;  %v1155_v62 = vpack.c.bf16 %v99_v56, %v83_v54  ;;  %v113_v2 = vld [vmem:[#allocation2 + $0x240] sm:$0xff] }
  0x42   :  { %1112 = vmatpush1.bf16.msra.mxu0 %v1111_v25  ;;  %v1141_v1 = vpack.c.bf16 %v130_v58, %v114_v57  ;;  %v129_v3 = vld [vmem:[#allocation2 + $0x2c0] sm:$0xff]  ;;  %v115_v4 = vld [vmem:[#allocation2 + $0x250] sm:$0xff]  ;;  %v1157_v5 = vpack.c.bf16 %v132_v60, %v116_v59  ;;  %v146_v7 = vld [vmem:[#allocation2 + $0x348] sm:$0xff] }
  0x43   :  { %1128 = vmatpush1.bf16.msra.mxu1 %v1127_v26  ;;  %1114 = vmatprep.subr.bf16.mxu0 %v1113_v27  ;;  %v131_v6 = vld [vmem:[#allocation2 + $0x2d0] sm:$0xff]  ;;  %v162_v8 = vld [vmem:[#allocation2 + $0x3c8] sm:$0xff]  ;;  %v148_v9 = vld [vmem:[#allocation2 + $0x358] sm:$0xff]  ;;  %v1143_v11 = vpack.c.bf16 %v129_v3, %v113_v2 }
  0x44   :  { %1130 = vmatprep.subr.bf16.mxu1 %v1129_v31  ;;  %v164_v10 = vld [vmem:[#allocation2 + $0x3d8] sm:$0xff]  ;;  %v1159_v12 = vpack.c.bf16 %v131_v6, %v115_v4  ;;  %v1145_v13 = vpack.c.bf16 %v162_v8, %v146_v7  ;;  %v145_v14 = vld [vmem:[#allocation2 + $0x340] sm:$0xff]  ;;  %v147_v16 = vld [vmem:[#allocation2 + $0x350] sm:$0xff] }
  0x45   :  { %v161_v15 = vld [vmem:[#allocation2 + $0x3c0] sm:$0xff]  ;;  %v1161_v17 = vpack.c.bf16 %v164_v10, %v148_v9  ;;  %v163_v18 = vld [vmem:[#allocation2 + $0x3d0] sm:$0xff]  ;;  %v54_v19 = vld [vmem:[#allocation2 + $0x68] sm:$0xff] }
  0x46   :  { %1116 = vmatpush1.bf16.msra.mxu0 %v1115_v37  ;;  %v70_v20 = vld [vmem:[#allocation2 + $0xe8] sm:$0xff]  ;;  %v56_v21 = vld [vmem:[#allocation2 + $0x78] sm:$0xff]  ;;  %v1147_v23 = vpack.c.bf16 %v161_v15, %v145_v14  ;;  %v1163_v24 = vpack.c.bf16 %v163_v18, %v147_v16  ;;  %v53_v26 = vld [vmem:[#allocation2 + $0x60] sm:$0xff] }
  0x47   :  { %1132 = vmatpush1.bf16.msra.mxu1 %v1131_v38  ;;  %1134 = vmatprep.subr.bf16.mxu0 %v1133_v39  ;;  %v72_v22 = vld [vmem:[#allocation2 + $0xf8] sm:$0xff]  ;;  %v1165_v25 = vpack.c.bf16 %v70_v20, %v54_v19  ;;  %v69_v27 = vld [vmem:[#allocation2 + $0xe0] sm:$0xff]  ;;  %v55_v28 = vld [vmem:[#allocation2 + $0x70] sm:$0xff] }
  0x48   :  { %1150 = vmatprep.subr.bf16.mxu1 %v1149_v43  ;;  %v1181_v29 = vpack.c.bf16 %v72_v22, %v56_v21  ;;  %v71_v30 = vld [vmem:[#allocation2 + $0xf0] sm:$0xff]  ;;  %v86_v31 = vld [vmem:[#allocation2 + $0x168] sm:$0xff]  ;;  %v88_v33 = vld [vmem:[#allocation2 + $0x178] sm:$0xff]  ;;  %v1167_v35 = vpack.c.bf16 %v69_v27, %v53_v26 }
  0x49   :  { %1047 = vmatmul.mubr.msk.f32.vlgmr.msra.gmra.mrb[2].mxu0 %vm253_vm0, %v1338_v63  ;;  %v102_v32 = vld [vmem:[#allocation2 + $0x1e8] sm:$0xff]  ;;  %v104_v34 = vld [vmem:[#allocation2 + $0x1f8] sm:$0xff]  ;;  %v1183_v36 = vpack.c.bf16 %v71_v30, %v55_v28  ;;  %v85_v38 = vld [vmem:[#allocation2 + $0x160] sm:$0xff] }
  0x4a   :  { %1048 = vmatmul.mubr.msk.f32.vlgmr.msra.gmra.mrb[2].mxu1 %vm253_vm0, %v1338_v63  ;;  %1136 = vmatpush1.bf16.msra.mxu0 %v1135_v49  ;;  %v1169_v37 = vpack.c.bf16 %v102_v32, %v86_v31  ;;  %v101_v39 = vld [vmem:[#allocation2 + $0x1e0] sm:$0xff]  ;;  %v87_v40 = vld [vmem:[#allocation2 + $0x170] sm:$0xff]  ;;  %v1185_v41 = vpack.c.bf16 %v104_v34, %v88_v33  ;;  %v118_v43 = vld [vmem:[#allocation2 + $0x268] sm:$0xff]  ;;  %v1288_v33 = vmov 1966171168  }
  0x4b   :  { %1152 = vmatpush1.bf16.msra.mxu1 %v1151_v50  ;;  %1138 = vmatprep.subr.bf16.mxu0 %v1137_v51  ;;  %v103_v42 = vld [vmem:[#allocation2 + $0x1f0] sm:$0xff]  ;;  %v134_v44 = vld [vmem:[#allocation2 + $0x2e8] sm:$0xff]  ;;  %v120_v45 = vld [vmem:[#allocation2 + $0x278] sm:$0xff]  ;;  %v1171_v47 = vpack.c.bf16 %v101_v39, %v85_v38  ;;  %v942_v34 = vunpack.c.l.s4 %v1288_v33 }
  0x4c   :  { %1154 = vmatprep.subr.bf16.mxu1 %v1153_v55  ;;  %605 = vmatprep.mubr.f32.mxu0 %v1287_v0  ;;  %v136_v46 = vld [vmem:[#allocation2 + $0x2f8] sm:$0xff]  ;;  %v1187_v48 = vpack.c.bf16 %v103_v42, %v87_v40  ;;  %v1173_v49 = vpack.c.bf16 %v134_v44, %v118_v43  ;;  %v117_v50 = vld [vmem:[#allocation2 + $0x260] sm:$0xff]  ;;  %v119_v52 = vld [vmem:[#allocation2 + $0x270] sm:$0xff] }
  0x4d   :  { %676 = vmatprep.mubr.f32.mxu1 %v1287_v0  ;;  %v133_v51 = vld [vmem:[#allocation2 + $0x2e0] sm:$0xff]  ;;  %v1189_v53 = vpack.c.bf16 %v136_v46, %v120_v45  ;;  %v135_v54 = vld [vmem:[#allocation2 + $0x2f0] sm:$0xff]  ;;  %v150_v55 = vld [vmem:[#allocation2 + $0x368] sm:$0xff]  ;;  %v943_v39 = vunpack.c.0.s8 %v942_v34 }
  0x4e   :  { %1140 = vmatpush1.bf16.msra.mxu0 %v1139_v61  ;;  %v166_v56 = vld [vmem:[#allocation2 + $0x3e8] sm:$0xff]  ;;  %v152_v57 = vld [vmem:[#allocation2 + $0x378] sm:$0xff]  ;;  %v1175_v59 = vpack.c.bf16 %v133_v51, %v117_v50  ;;  %v1191_v60 = vpack.c.bf16 %v135_v54, %v119_v52  ;;  %v151_v3 = vld [vmem:[#allocation2 + $0x370] sm:$0xff] }
  0x4f   :  { %1156 = vmatpush1.bf16.msra.mxu1 %v1155_v62  ;;  %1142 = vmatprep.subr.bf16.mxu0 %v1141_v1  ;;  %v168_v58 = vld [vmem:[#allocation2 + $0x3f8] sm:$0xff]  ;;  %v1177_v61 = vpack.c.bf16 %v166_v56, %v150_v55  ;;  %v149_v62 = vld [vmem:[#allocation2 + $0x360] sm:$0xff]  ;;  %v167_v4 = vld [vmem:[#allocation2 + $0x3f0] sm:$0xff] }
  0x50   :  { %1158 = vmatprep.subr.bf16.mxu1 %v1157_v5  ;;  %v165_v1 = vld [vmem:[#allocation2 + $0x3e0] sm:$0xff]  ;;  %v1193_v2 = vpack.c.bf16 %v168_v58, %v152_v57  ;;  %v1195_v6 = vpack.c.bf16 %v167_v4, %v151_v3 }
  0x51   :  { %v1179_v5 = vpack.c.bf16 %v165_v1, %v149_v62  ;;  %v169_v9 = vld [vmem:[#allocation4] sm:$0xff] }
  0x52   :  { %1144 = vmatpush1.bf16.msra.mxu0 %v1143_v11 }
  0x53   :  { %1160 = vmatpush1.bf16.msra.mxu1 %v1159_v12  ;;  %1146 = vmatprep.subr.bf16.mxu0 %v1145_v13 }
  0x54   :  { %1162 = vmatprep.subr.bf16.mxu1 %v1161_v17 }
  0x56   :  { %1148 = vmatpush1.bf16.msra.mxu0 %v1147_v23 }
  0x57   :  { %1164 = vmatpush1.bf16.msra.mxu1 %v1163_v24  ;;  %1166 = vmatprep.subr.bf16.mxu0 %v1165_v25 }
  0x58   :  { %1182 = vmatprep.subr.bf16.mxu1 %v1181_v29 }
  0x59   :  { %1049 = vmatmul.mubr.msk.f32.vlgmr.msra.gmra.mrb[4].mxu0 %vm253_vm0, %v1338_v63 }
  0x5a   :  { %1050 = vmatmul.mubr.msk.f32.vlgmr.msra.gmra.mrb[4].mxu1 %vm253_vm0, %v1338_v63  ;;  %1168 = vmatpush1.bf16.msra.mxu0 %v1167_v35 }
  0x5b   :  { %1184 = vmatpush1.bf16.msra.mxu1 %v1183_v36  ;;  %1170 = vmatprep.subr.bf16.mxu0 %v1169_v37 }
  0x5c   :  { %1186 = vmatprep.subr.bf16.mxu1 %v1185_v41  ;;  %747 = vmatprep.mubr.f32.mxu0 %v1287_v0 }
  0x5d   :  { %818 = vmatprep.mubr.f32.mxu1 %v1287_v0  ;;  %v173_v0 = vlaneseq }
  0x5e   :  { %1172 = vmatpush1.bf16.msra.mxu0 %v1171_v47 }
  0x5f   :  { %1188 = vmatpush1.bf16.msra.mxu1 %v1187_v48  ;;  %1174 = vmatprep.subr.bf16.mxu0 %v1173_v49  ;;  %v1362_v7 = vshrl.u32 %v173_v0, 7 }
  0x60   :  { %1190 = vmatprep.subr.bf16.mxu1 %v1189_v53 }
  0x61   :  { %v175_v8 = vsub.s32 0, %v1362_v7  ;;  %v183_v10 = vsub.s32 2, %v1362_v7  ;;  %v179_v11 = vsub.s32 1, %v1362_v7  ;;  %v187_v12 = vsub.s32 3, %v1362_v7 }
  0x62   :  { %1176 = vmatpush1.bf16.msra.mxu0 %v1175_v59  ;;  %v191_v32 = vsub.s32 4, %v1362_v7  ;;  %v199_v35 = vsub.s32 6, %v1362_v7  ;;  %v195_v36 = vsub.s32 5, %v1362_v7  ;;  %v203_v37 = vsub.s32 7, %v1362_v7 }
  0x63   :  { %1192 = vmatpush1.bf16.msra.mxu1 %v1191_v60  ;;  %1178 = vmatprep.subr.bf16.mxu0 %v1177_v61  ;;  %v176_v13 = vrot.slane %v169_v9, %v175_v8  ;;  %v184_v14 = vrot.slane %v169_v9, %v183_v10  ;;  %v188_v15 = vrot.slane %v169_v9, %v187_v12 }
  0x64   :  { %1194 = vmatprep.subr.bf16.mxu1 %v1193_v2  ;;  %v192_v38 = vrot.slane %v169_v9, %v191_v32  ;;  %v200_v40 = vrot.slane %v169_v9, %v199_v35  ;;  %v196_v41 = vrot.slane %v169_v9, %v195_v36  ;;  %v204_v42 = vrot.slane %v169_v9, %v203_v37 }
  0x65   :  { %v1391_v50 = vsub.s32 %v943_v39, %v1362_v7 }
  0x66   :  { %1180 = vmatpush1.bf16.msra.mxu0 %v1179_v5 }
  0x67   :  { %1196 = vmatpush1.bf16.msra.mxu1 %v1195_v6 }
  0x69   :  { %1051 = vmatmul.mubr.msk.f32.vlgmr.msra.gmra.mrb[6].mxu0 %vm253_vm0, %v1338_v63 }
  0x6a   :  { %1052 = vmatmul.mubr.msk.f32.vlgmr.msra.gmra.mrb[6].mxu1 %vm253_vm0, %v1338_v63  ;;  %v180_v63 = vrot.slane %v169_v9, %v179_v11 }
 0x10c   :  { %v323_v16 = vpop.f32.mrb[0].mxu0 }
 0x10d   :  { %v324_v17 = vadd.f32 %v323_v16, %v176_v13  ;;  %v394_v18 = vpop.f32.mrb[0].mxu1  ;;  %v325_v19 = vpop.f32.mrb[1].mxu0 }
 0x10e   :  { %v395_v20 = vadd.f32 %v394_v18, %v184_v14  ;;  %v326_v21 = vadd.f32 %v325_v19, %v180_v63  ;;  %v396_v22 = vpop.f32.mrb[1].mxu1 }
 0x10f   :  { %v841_v23 = vmin.f32 %v324_v17, 0.0  ;;  %v397_v24 = vadd.f32 %v396_v22, %v188_v15  ;;  %vm825_vm1 = vcmp.gt.f32.partialorder %v324_v17, 0.0 }
 0x110   :  { %v843_v25 = vmin.f32 %v395_v20, 0.0  ;;  %v842_v26 = vmin.f32 %v326_v21, 0.0  ;;  %vm827_vm2 = vcmp.gt.f32.partialorder %v395_v20, 0.0  ;;  %vm826_vm3 = vcmp.gt.f32.partialorder %v326_v21, 0.0 }
 0x111   :  { %v857_v27 = vmul.f32 1.442695, %v841_v23  ;;  %v844_v28 = vmin.f32 %v397_v24, 0.0  ;;  %vm828_vm4 = vcmp.gt.f32.partialorder %v397_v24, 0.0 }
 0x112   :  { %v861_v29 = vmul.f32 1.442695, %v843_v25  ;;  %v859_v30 = vmul.f32 1.442695, %v842_v26 }
 0x113   :  { %1203 = vpow2.f32 %v857_v27  ;;  %v863_v31 = vmul.f32 1.442695, %v844_v28 }
 0x114   :  { %1205 = vpow2.f32 %v861_v29 }
 0x115   :  { %1207 = vpow2.f32 %v859_v30 }
 0x116   :  { %1209 = vpow2.f32 %v863_v31 }
 0x11c   :  { %v465_v43 = vpop.f32.mrb[2].mxu0 }
 0x11d   :  { %v1204_v44 = vpop.eup %1203  ;;  %v1388_v45 = vadd.f32 %v465_v43, %v192_v38  ;;  %v536_v46 = vpop.f32.mrb[2].mxu1 }
 0x11e   :  { %v467_v47 = vpop.f32.mrb[3].mxu0  ;;  %v1206_v48 = vpop.eup %1205  ;;  %v1053_v49 = vadd.f32 -1.0, %v1204_v44  ;;  %v1393_v51 = vadd.f32 %v536_v46, %v200_v40 }
 0x11f   :  { %v1395_v52 = vadd.f32 %v467_v47, %v196_v41  ;;  %v538_v53 = vpop.f32.mrb[3].mxu1  ;;  %v1208_v54 = vpop.eup %1207  ;;  %v1055_v55 = vadd.f32 -1.0, %v1206_v48  ;;  %v845_v56 = vmin.f32 %v1388_v45, 0.0  ;;  %vm829_vm5 = vcmp.gt.f32.partialorder %v1388_v45, 0.0 }
 0x120   :  { %v1398_v57 = vadd.f32 %v538_v53, %v204_v42  ;;  %v1210_v58 = vpop.eup %1209  ;;  %v905_v59 = vsel %vm825_vm1, %v324_v17, %v1053_v49  ;;  %v1054_v60 = vadd.f32 -1.0, %v1208_v54  ;;  %v847_v61 = vmin.f32 %v1393_v51, 0.0  ;;  %v170_v17 = vld [vmem:[#allocation4 + $0x8] sm:$0xff] }
 0x121   :  { %v907_v62 = vsel %vm827_vm2, %v395_v20, %v1055_v55  ;;  %v1056_v1 = vadd.f32 -1.0, %v1210_v58  ;;  %v865_v2 = vmul.f32 1.442695, %v845_v56  ;;  %v846_v5 = vmin.f32 %v1395_v52, 0.0 }
 0x122   :  { %v906_v3 = vsel %vm826_vm3, %v326_v21, %v1054_v60  ;;  %v869_v4 = vmul.f32 1.442695, %v847_v61  ;;  %v848_v9 = vmin.f32 %v1398_v57, 0.0  ;;  %v208_v19 = vrot.slane %v170_v17, %v175_v8 }
 0x123   :  { %v937_v6 = vcombine.low %v905_v59, %v906_v3  ;;  %v908_v0 = vsel %vm828_vm4, %v397_v24, %v1056_v1  ;;  %1211 = vpow2.f32 %v865_v2  ;;  %v867_v14 = vmul.f32 1.442695, %v846_v5 }
 0x124   :  { %v938_v13 = vcombine.low %v907_v62, %v908_v0  ;;  %1213 = vpow2.f32 %v869_v4  ;;  %v871_v15 = vmul.f32 1.442695, %v848_v9  ;;  %v216_v20 = vrot.slane %v170_v17, %v183_v10 }
 0x125   :  { %v947_v63 = vrot.slane %v937_v6, %v1391_v50  ;;  %1215 = vpow2.f32 %v867_v14  ;;  %v212_v21 = vrot.slane %v170_v17, %v179_v11  ;;  %v220_v22 = vrot.slane %v170_v17, %v187_v12 }
 0x126   :  { %v954_v16 = vrot.slane %v938_v13, %v1391_v50  ;;  %1217 = vpow2.f32 %v871_v15  ;;  %vm831_vm6 = vcmp.gt.f32.partialorder %v1393_v51, 0.0  ;;  %vm830_vm7 = vcmp.gt.f32.partialorder %v1395_v52, 0.0 }
 0x127   :  { %vm832_vm8 = vcmp.gt.f32.partialorder %v1398_v57, 0.0  ;;  %v232_v59 = vrot.slane %v170_v17, %v199_v35  ;;  %v228_v60 = vrot.slane %v170_v17, %v195_v36  ;;  %v236_v62 = vrot.slane %v170_v17, %v203_v37 }
 0x128   :  { %v969_v18 = vcombine.low %v947_v63, %v954_v16 }
 0x12c   :  { %v607_v23 = vpop.f32.mrb[4].mxu0 }
 0x12d   :  { %v1212_v24 = vpop.eup %1211  ;;  %v1413_v25 = vadd.f32 %v607_v23, %v208_v19  ;;  %v678_v26 = vpop.f32.mrb[4].mxu1 }
 0x12e   :  { %v609_v27 = vpop.f32.mrb[5].mxu0  ;;  %v1214_v28 = vpop.eup %1213  ;;  %v1057_v29 = vadd.f32 -1.0, %v1212_v24  ;;  %v1415_v30 = vadd.f32 %v678_v26, %v216_v20 }
 0x12f   :  { %v1417_v8 = vadd.f32 %v609_v27, %v212_v21  ;;  %v680_v31 = vpop.f32.mrb[5].mxu1  ;;  %v1059_v10 = vadd.f32 -1.0, %v1214_v28  ;;  %v849_v33 = vmin.f32 %v1413_v25, 0.0  ;;  %v1216_v34 = vpop.eup %1215  ;;  %vm833_vm9 = vcmp.gt.f32.partialorder %v1413_v25, 0.0 }
 0x130   :  { %v1420_v11 = vadd.f32 %v680_v31, %v220_v22  ;;  %v851_v12 = vmin.f32 %v1415_v30, 0.0  ;;  %v1218_v38 = vpop.eup %1217  ;;  %v909_v39 = vsel %vm829_vm5, %v1388_v45, %v1057_v29  ;;  %v1058_v40 = vadd.f32 -1.0, %v1216_v34 }
 0x131   :  { %v873_v41 = vmul.f32 1.442695, %v849_v33  ;;  %v850_v42 = vmin.f32 %v1417_v8, 0.0  ;;  %v911_v43 = vsel %vm831_vm6, %v1393_v51, %v1059_v10  ;;  %v1060_v44 = vadd.f32 -1.0, %v1218_v38 }
 0x132   :  { %v877_v46 = vmul.f32 1.442695, %v851_v12  ;;  %v852_v47 = vmin.f32 %v1420_v11, 0.0  ;;  %v910_v48 = vsel %vm830_vm7, %v1395_v52, %v1058_v40  ;;  %v224_v52 = vrot.slane %v170_v17, %v191_v32 }
 0x133   :  { %1219 = vpow2.f32 %v873_v41  ;;  %v875_v49 = vmul.f32 1.442695, %v850_v42  ;;  %v939_v53 = vcombine.low %v909_v39, %v910_v48  ;;  %v912_v54 = vsel %vm832_vm8, %v1398_v57, %v1060_v44 }
 0x134   :  { %1221 = vpow2.f32 %v877_v46  ;;  %v879_v45 = vmul.f32 1.442695, %v852_v47  ;;  %v940_v55 = vcombine.low %v911_v43, %v912_v54  ;;  %v977_v57 = vrot.slane %v969_v18, %v1391_v50 }
 0x135   :  { %1223 = vpow2.f32 %v875_v49  ;;  %v961_v56 = vrot.slane %v939_v53, %v1391_v50  ;;  %vm835_vm10 = vcmp.gt.f32.partialorder %v1415_v30, 0.0  ;;  %vm834_vm11 = vcmp.gt.f32.partialorder %v1417_v8, 0.0 }
 0x136   :  { %1225 = vpow2.f32 %v879_v45  ;;  %v968_v51 = vrot.slane %v940_v55, %v1391_v50  ;;  %vm836_vm12 = vcmp.gt.f32.partialorder %v1420_v11, 0.0 }
 0x138   :  { %v970_v58 = vcombine.low %v961_v56, %v968_v51 }
 0x13a   :  { %v984_v61 = vrot.slane %v970_v58, %v1391_v50 }
 0x13c   :  { %v749_v1 = vpop.f32.mrb[6].mxu0  ;;  %v985_v3 = vcombine.low %v977_v57, %v984_v61 }
 0x13d   :  { %v1220_v2 = vpop.eup %1219  ;;  %v750_v4 = vadd.f32 %v749_v1, %v224_v52  ;;  %v820_v5 = vpop.f32.mrb[6].mxu1 }
 0x13e   :  { %v751_v6 = vpop.f32.mrb[7].mxu0  ;;  %v1222_v32 = vpop.eup %1221  ;;  %v1061_v0 = vadd.f32 -1.0, %v1220_v2  ;;  %v821_v9 = vadd.f32 %v820_v5, %v232_v59  ;;  %1037 = vst [vmem:[%s1468_s3] sm:$0xff] %v985_v3 }
 0x13f   :  { %v752_v35 = vadd.f32 %v751_v6, %v228_v60  ;;  %v822_v13 = vpop.f32.mrb[7].mxu1  ;;  %v1224_v14 = vpop.eup %1223  ;;  %v1063_v7 = vadd.f32 -1.0, %v1222_v32  ;;  %v853_v36 = vmin.f32 %v750_v4, 0.0  ;;  %vm837_vm13 = vcmp.gt.f32.partialorder %v750_v4, 0.0 }
 0x140   :  { %v823_v37 = vadd.f32 %v822_v13, %v236_v62  ;;  %v1226_v63 = vpop.eup %1225  ;;  %v913_v15 = vsel %vm833_vm9, %v1413_v25, %v1061_v0  ;;  %v1062_v16 = vadd.f32 -1.0, %v1224_v14  ;;  %v855_v17 = vmin.f32 %v821_v9, 0.0 }
 0x141   :  { %v915_v18 = vsel %vm835_vm10, %v1415_v30, %v1063_v7  ;;  %v1064_v19 = vadd.f32 -1.0, %v1226_v63  ;;  %v881_v20 = vmul.f32 1.442695, %v853_v36  ;;  %v854_v23 = vmin.f32 %v752_v35, 0.0 }
 0x142   :  { %v914_v21 = vsel %vm834_vm11, %v1417_v8, %v1062_v16  ;;  %v885_v22 = vmul.f32 1.442695, %v855_v17  ;;  %v856_v25 = vmin.f32 %v823_v37, 0.0  ;;  %vm839_vm14 = vcmp.gt.f32.partialorder %v821_v9, 0.0 }
 0x143   :  { %v986_v24 = vcombine.low %v913_v15, %v914_v21  ;;  %v916_v26 = vsel %vm836_vm12, %v1420_v11, %v1064_v19  ;;  %1227 = vpow2.f32 %v881_v20  ;;  %v883_v28 = vmul.f32 1.442695, %v854_v23 }
 0x144   :  { %v987_v27 = vcombine.low %v915_v18, %v916_v26  ;;  %1229 = vpow2.f32 %v885_v22  ;;  %v887_v30 = vmul.f32 1.442695, %v856_v25  ;;  %vm838_vm15 = vcmp.gt.f32.partialorder %v752_v35, 0.0 }
 0x145   :  { %v996_v29 = vrot.slane %v986_v24, %v1391_v50  ;;  %1231 = vpow2.f32 %v883_v28  ;;  %vm840_vm0 = vcmp.gt.f32.partialorder %v823_v37, 0.0 }
 0x146   :  { %v1003_v31 = vrot.slane %v987_v27, %v1391_v50  ;;  %1233 = vpow2.f32 %v887_v30 }
 0x148   :  { %v1018_v8 = vcombine.low %v996_v29, %v1003_v31 }
 0x14a   :  { %v1026_v54 = vrot.slane %v1018_v8, %v1391_v50 }
 0x14d   :  { %v1228_v10 = vpop.eup %1227 }
 0x14e   :  { %v1230_v33 = vpop.eup %1229  ;;  %v1065_v34 = vadd.f32 -1.0, %v1228_v10 }
 0x14f   :  { %v1067_v12 = vadd.f32 -1.0, %v1230_v33  ;;  %v1232_v38 = vpop.eup %1231 }
 0x150   :  { %v1234_v11 = vpop.eup %1233  ;;  %v917_v39 = vsel %vm837_vm13, %v750_v4, %v1065_v34  ;;  %v1066_v40 = vadd.f32 -1.0, %v1232_v38 }
 0x151   :  { %v919_v41 = vsel %vm839_vm14, %v821_v9, %v1067_v12  ;;  %v1068_v42 = vadd.f32 -1.0, %v1234_v11 }
 0x152   :  { %v918_v43 = vsel %vm838_vm15, %v752_v35, %v1066_v40 }
 0x153   :  { %v988_v44 = vcombine.low %v917_v39, %v918_v43  ;;  %v920_v46 = vsel %vm840_vm0, %v823_v37, %v1068_v42 }
 0x154   :  { %v989_v47 = vcombine.low %v919_v41, %v920_v46 }
 0x155   :  { %v1010_v48 = vrot.slane %v988_v44, %v1391_v50 }
 0x156   :  { %v1017_v49 = vrot.slane %v989_v47, %v1391_v50 }
 0x158   :  { %v1019_v53 = vcombine.low %v1010_v48, %v1017_v49 }
 0x15a   :  { %v1033_v45 = vrot.slane %v1019_v53, %v1391_v50 }
 0x15c   :  { %v1034_v55 = vcombine.low %v1026_v54, %v1033_v45 }
 0x15e   :  { %1038 = vst [vmem:[%s1468_s3 + $0x8] sm:$0xff] %v1034_v55 }
 0x15f   :  { %1043 = vsyncpa [#allocation3], 1 }
 0x160   :  { %1044 = vsyncpa [#allocation5], 1 }

</bundles_post_ra>
